<compile_context>
chip_gen: v7x
topology: tpu7x:2x2x1
jax: 0.10.0
libtpu: 0.0.40
codegen_flags: <defaults>
</compile_context>

<pallas_src>
import functools

import jax
import jax.numpy as jnp
from jax.experimental import pallas as pl
from jax.experimental.pallas import tpu as pltpu


_DP = 8  # feature rows padded to one full sublane group (D + 1 = 4 -> 8)


def _round_up(x, m):
    return ((x + m - 1) // m) * m


def _flow_mlp_kernel(xt_ref, w1_ref, b1_ref, w2_ref, b2_ref, w3_ref, b3_ref,
                     o_ref):
    """Feature-major fused MLP: every layer is W(out,in) @ act(in, tile)."""
    # Layer 1: (H, 8) @ (8, TN) on the MXU, K=8.  Kept f32 (inputs are raw
    # point coordinates; this matmul is tiny so the f32 cost is negligible).
    h = jnp.dot(w1_ref[...], xt_ref[...], preferred_element_type=jnp.float32)
    h = jnp.maximum(h + b1_ref[...], 0.0)                        # (H, TN) f32

    # Layer 2: (H, H) @ (H, TN) — the dominant matmul; operands in
    # compute_dtype (bf16 in production), f32 accumulation, f32 bias.
    h = jnp.dot(w2_ref[...], h.astype(w2_ref.dtype),
                preferred_element_type=jnp.float32)
    h = jnp.maximum(h + b2_ref[...], 0.0)                        # (H, TN) f32

    # Layer 3: (8, H) @ (H, TN) — only 3 useful output rows; as an 8-row LHS
    # this is near-free on the MXU.
    out = jnp.dot(w3_ref[...], h.astype(w3_ref.dtype),
                  preferred_element_type=jnp.float32)
    o_ref[...] = (out + b3_ref[...]).astype(o_ref.dtype)


@functools.partial(jax.jit, static_argnames=("tile_n", "compute_dtype"))
def flow_model_forward(x, t, params, *, tile_n=2048,
                       compute_dtype=jnp.bfloat16):
    """x: (N, D) f32, t: (N, 1) / (N,) / scalar.  Returns (N, D) in x.dtype.

    compute_dtype=bfloat16 is the production path (f32 accumulation on the
    MXU).  compute_dtype=float32 is for validation only — it triggers the
    multi-pass f32 MXU path (~3x cost on v5e/v6e/v7x).
    """
    N, D = x.shape
    H = params["w2"].shape[0]
    f32 = jnp.float32
    assert D + 1 <= _DP

    # ---- point-tile / grid selection --------------------------------------
    tile = max(128, min(tile_n, _round_up(N, 128)))
    # Keep >= 8 grid steps (>= 2 minimum) when N allows so the "parallel"
    # point axis can be split across v7x's two TensorCores; the 512 floor keeps
    # the ~0.35 us/step grid overhead amortized.
    while tile > 512 and pl.cdiv(N, tile) < 8:
        tile //= 2
    n_pad = _round_up(N, tile)
    grid = (n_pad // tile,)

    # ---- inputs: points-on-lanes, feature rows zero-padded 4 -> 8 ---------
    t_row = jnp.broadcast_to(jnp.asarray(t, x.dtype).reshape(-1), (N,))
    xt_t = jnp.concatenate(
        [x.T.astype(f32),
         t_row.reshape(1, N).astype(f32),
         jnp.zeros((_DP - (D + 1), N), f32)], axis=0)            # (8, N)
    if n_pad != N:
        xt_t = jnp.pad(xt_t, ((0, 0), (0, n_pad - N)))           # (8, n_pad)

    # ---- weights (PyTorch (out_features, in_features) orientation) --------
    w1 = jnp.pad(params["w1"].astype(f32), ((0, 0), (0, _DP - (D + 1))))  # (H, 8)
    b1 = params["b1"].reshape(H, 1).astype(f32)
    w2 = params["w2"].astype(compute_dtype)                                # (H, H)
    b2 = params["b2"].reshape(H, 1).astype(f32)
    w3 = jnp.pad(params["w3"].astype(compute_dtype),
                 ((0, _DP - D), (0, 0)))                                   # (8, H)
    b3 = jnp.pad(params["b3"].reshape(D, 1).astype(f32),
                 ((0, _DP - D), (0, 0)))                                   # (8, 1)

    lane_spec = pl.BlockSpec((_DP, tile), lambda i: (0, i))
    const_spec = lambda shape: pl.BlockSpec(shape, lambda i: (0, 0))

    flops = 2 * n_pad * H * (2 * _DP + H)
    bytes_accessed = (xt_t.size * 4 + _DP * n_pad * 4
                      + w1.size * 4
                      + w2.size * w2.dtype.itemsize
                      + w3.size * w3.dtype.itemsize
                      + (2 * H + _DP) * 4)

    out_t = pl.pallas_call(
        _flow_mlp_kernel,
        out_shape=jax.ShapeDtypeStruct((_DP, n_pad), x.dtype),
        grid_spec=pltpu.PrefetchScalarGridSpec(
            num_scalar_prefetch=0,
            grid=grid,
            in_specs=[
                lane_spec,                  # xt^T tile (8, tile)
                const_spec((H, _DP)),       # W1 (f32, zero-padded cols)
                const_spec((H, 1)),         # b1
                const_spec((H, H)),         # W2 (compute_dtype)
                const_spec((H, 1)),         # b2
                const_spec((_DP, H)),       # W3 (compute_dtype, zero-padded rows)
                const_spec((_DP, 1)),       # b3 (zero-padded rows)
            ],
            out_specs=lane_spec,            # out^T tile (8, tile)
        ),
        compiler_params=pltpu.CompilerParams(
            dimension_semantics=("parallel",),
            vmem_limit_bytes=32 * 1024 * 1024),
        cost_estimate=pl.CostEstimate(flops=flops, transcendentals=0,
                                      bytes_accessed=bytes_accessed),
    )(xt_t, w1, b1, w2, b2, w3, b3)

    return out_t[:D, :N].T


def init_flow_model_params(key, input_dim=3, hidden_dim=128, dtype=jnp.float32):
    """PyTorch nn.Linear init: U(-1/sqrt(fan_in), +1/sqrt(fan_in)).

    Weights stored in PyTorch (out_features, in_features) orientation, which is
    exactly the orientation the feature-major kernel consumes (W @ x^T).
    """
    def linear(k, fan_in, fan_out):
        kw, kb = jax.random.split(k)
        bound = 1.0 / (fan_in ** 0.5)
        w = jax.random.uniform(kw, (fan_out, fan_in), dtype, -bound, bound)
        b = jax.random.uniform(kb, (fan_out,), dtype, -bound, bound)
        return w, b

    k1, k2, k3 = jax.random.split(key, 3)
    w1, b1 = linear(k1, input_dim + 1, hidden_dim)
    w2, b2 = linear(k2, hidden_dim, hidden_dim)
    w3, b3 = linear(k3, hidden_dim, input_dim)
    return {"w1": w1, "b1": b1, "w2": w2, "b2": b2, "w3": w3, "b3": b3}


def _reference_forward(x, t, params):
    """Pure-JAX f32 reference of the same semantics (PyTorch orientation)."""
    N = x.shape[0]
    t = jnp.broadcast_to(jnp.asarray(t, x.dtype).reshape(-1), (N,)).reshape(N, 1)
    xt = jnp.concatenate([x, t], axis=-1)
    h = jax.nn.relu(xt @ params["w1"].T + params["b1"])
    h = jax.nn.relu(h @ params["w2"].T + params["b2"])
    return h @ params["w3"].T + params["b3"]


if __name__ == "__main__":
    INPUT_DIM = 3
    HIDDEN_DIM = 128
    N_POINTS = 1000        # deliberately NOT a tile multiple -> exercises padding

    key = jax.random.PRNGKey(0)
    kx, kt, kp = jax.random.split(key, 3)

    x = jax.random.normal(kx, (N_POINTS, INPUT_DIM), jnp.float32)
    t = jax.random.uniform(kt, (N_POINTS, 1), jnp.float32)
    params = init_flow_model_params(kp, INPUT_DIM, HIDDEN_DIM)

    ref = _reference_forward(x, t, params)

    # Validation-only full-f32 path.
    out_f32 = jax.block_until_ready(
        flow_model_forward(x, t, params, compute_dtype=jnp.float32))
    assert out_f32.shape == (N_POINTS, INPUT_DIM)
    assert jnp.allclose(out_f32, ref, atol=1e-4, rtol=1e-4), "f32 mismatch vs reference"

    # Production bf16-operand / f32-accumulation path.
    out_bf16 = jax.block_until_ready(flow_model_forward(x, t, params))
    assert out_bf16.shape == (N_POINTS, INPUT_DIM)
    assert jnp.allclose(out_bf16, ref, atol=2e-2, rtol=2e-2), "bf16 mismatch vs reference"

    print("KERNEL_OK")
</pallas_src>

<mosaic_0001>
module attributes {stable_mosaic.version = 11 : i64} {
  func.func @_flow_mlp_kernel(%arg0: i32, %arg1: memref<8x512xf32, #tpu.memory_space<vmem>>, %arg2: memref<128x8xf32, #tpu.memory_space<vmem>>, %arg3: memref<128x1xf32, #tpu.memory_space<vmem>>, %arg4: memref<128x128xf32, #tpu.memory_space<vmem>>, %arg5: memref<128x1xf32, #tpu.memory_space<vmem>>, %arg6: memref<8x128xf32, #tpu.memory_space<vmem>>, %arg7: memref<8x1xf32, #tpu.memory_space<vmem>>, %arg8: memref<8x512xf32, #tpu.memory_space<vmem>>) attributes {dimension_semantics = [#tpu.dimension_semantics<parallel>], iteration_bounds = array<i64: 2>, scalar_prefetch = 0 : i64, scratch_operands = 0 : i64, tpu.core_type = #tpu.core_type<tc>, window_params = [{transform_indices = @transform_0, window_bounds = array<i64: 8, 512>}, {pipeline_mode = #tpu.pipeline_mode<synchronous>, transform_indices = @transform_1, window_bounds = array<i64: 128, 8>}, {pipeline_mode = #tpu.pipeline_mode<synchronous>, transform_indices = @transform_2, window_bounds = array<i64: 128, 1>}, {pipeline_mode = #tpu.pipeline_mode<synchronous>, transform_indices = @transform_3, window_bounds = array<i64: 128, 128>}, {pipeline_mode = #tpu.pipeline_mode<synchronous>, transform_indices = @transform_4, window_bounds = array<i64: 128, 1>}, {pipeline_mode = #tpu.pipeline_mode<synchronous>, transform_indices = @transform_5, window_bounds = array<i64: 8, 128>}, {pipeline_mode = #tpu.pipeline_mode<synchronous>, transform_indices = @transform_6, window_bounds = array<i64: 8, 1>}, {transform_indices = @transform_7, window_bounds = array<i64: 8, 512>}]} {
    %c0 = arith.constant 0 : index
    %c0_0 = arith.constant 0 : index
    %0 = vector.load %arg2[%c0, %c0_0] : memref<128x8xf32, #tpu.memory_space<vmem>>, vector<128x8xf32>
    %c0_1 = arith.constant 0 : index
    %c0_2 = arith.constant 0 : index
    %1 = vector.load %arg1[%c0_1, %c0_2] : memref<8x512xf32, #tpu.memory_space<vmem>>, vector<8x512xf32>
    %cst = arith.constant dense<0.000000e+00> : vector<128x512xf32>
    %2 = tpu.matmul %0, %1, %cst {dimension_numbers = #tpu.dot_dimension_numbers<[1], [0], [0], [1], [0, 0, 1, 1], [], []>} : vector<128x8xf32>, vector<8x512xf32>, vector<128x512xf32> -> vector<128x512xf32>
    %c0_3 = arith.constant 0 : index
    %c0_4 = arith.constant 0 : index
    %3 = vector.load %arg3[%c0_3, %c0_4] : memref<128x1xf32, #tpu.memory_space<vmem>>, vector<128x1xf32>
    %4 = vector.broadcast %3 : vector<128x1xf32> to vector<128x512xf32>
    %5 = arith.addf %2, %4 : vector<128x512xf32>
    %cst_5 = arith.constant 0.000000e+00 : f32
    %6 = vector.broadcast %cst_5 : f32 to vector<128x512xf32>
    %7 = arith.maximumf %5, %6 : vector<128x512xf32>
    %c0_6 = arith.constant 0 : index
    %c0_7 = arith.constant 0 : index
    %8 = vector.load %arg4[%c0_6, %c0_7] : memref<128x128xf32, #tpu.memory_space<vmem>>, vector<128x128xf32>
    %cst_8 = arith.constant dense<0.000000e+00> : vector<128x512xf32>
    %9 = tpu.matmul %8, %7, %cst_8 {dimension_numbers = #tpu.dot_dimension_numbers<[1], [0], [0], [1], [0, 0, 1, 1], [], []>} : vector<128x128xf32>, vector<128x512xf32>, vector<128x512xf32> -> vector<128x512xf32>
    %c0_9 = arith.constant 0 : index
    %c0_10 = arith.constant 0 : index
    %10 = vector.load %arg5[%c0_9, %c0_10] : memref<128x1xf32, #tpu.memory_space<vmem>>, vector<128x1xf32>
    %11 = vector.broadcast %10 : vector<128x1xf32> to vector<128x512xf32>
    %12 = arith.addf %9, %11 : vector<128x512xf32>
    %cst_11 = arith.constant 0.000000e+00 : f32
    %13 = vector.broadcast %cst_11 : f32 to vector<128x512xf32>
    %14 = arith.maximumf %12, %13 : vector<128x512xf32>
    %c0_12 = arith.constant 0 : index
    %c0_13 = arith.constant 0 : index
    %15 = vector.load %arg6[%c0_12, %c0_13] : memref<8x128xf32, #tpu.memory_space<vmem>>, vector<8x128xf32>
    %cst_14 = arith.constant dense<0.000000e+00> : vector<8x512xf32>
    %16 = tpu.matmul %15, %14, %cst_14 {dimension_numbers = #tpu.dot_dimension_numbers<[1], [0], [0], [1], [0, 0, 1, 1], [], []>} : vector<8x128xf32>, vector<128x512xf32>, vector<8x512xf32> -> vector<8x512xf32>
    %c0_15 = arith.constant 0 : index
    %c0_16 = arith.constant 0 : index
    %17 = vector.load %arg7[%c0_15, %c0_16] : memref<8x1xf32, #tpu.memory_space<vmem>>, vector<8x1xf32>
    %18 = vector.broadcast %17 : vector<8x1xf32> to vector<8x512xf32>
    %19 = arith.addf %16, %18 : vector<8x512xf32>
    %c0_17 = arith.constant 0 : index
    %c0_18 = arith.constant 0 : index
    %20 = vector.load %arg8[%c0_17, %c0_18] : memref<8x512xf32, #tpu.memory_space<vmem>>, vector<8x512xf32>
    tpu.vector_store %arg8[%c0_17, %c0_18], %19 {strides = array<i32>} : memref<8x512xf32, #tpu.memory_space<vmem>>, vector<8x512xf32>,
    return
  }
  func.func @transform_0(%arg0: i32) -> (i32, i32) {
    %c0_i32 = arith.constant 0 : i32
    %c0_i32_0 = arith.constant 0 : i32
    return %c0_i32, %arg0 : i32, i32
  }
  func.func @transform_1(%arg0: i32) -> (i32, i32) {
    %c0_i32 = arith.constant 0 : i32
    %c0_i32_0 = arith.constant 0 : i32
    %c0_i32_1 = arith.constant 0 : i32
    return %c0_i32, %c0_i32_0 : i32, i32
  }
  func.func @transform_2(%arg0: i32) -> (i32, i32) {
    %c0_i32 = arith.constant 0 : i32
    %c0_i32_0 = arith.constant 0 : i32
    %c0_i32_1 = arith.constant 0 : i32
    return %c0_i32, %c0_i32_0 : i32, i32
  }
  func.func @transform_3(%arg0: i32) -> (i32, i32) {
    %c0_i32 = arith.constant 0 : i32
    %c0_i32_0 = arith.constant 0 : i32
    %c0_i32_1 = arith.constant 0 : i32
    return %c0_i32, %c0_i32_0 : i32, i32
  }
  func.func @transform_4(%arg0: i32) -> (i32, i32) {
    %c0_i32 = arith.constant 0 : i32
    %c0_i32_0 = arith.constant 0 : i32
    %c0_i32_1 = arith.constant 0 : i32
    return %c0_i32, %c0_i32_0 : i32, i32
  }
  func.func @transform_5(%arg0: i32) -> (i32, i32) {
    %c0_i32 = arith.constant 0 : i32
    %c0_i32_0 = arith.constant 0 : i32
    %c0_i32_1 = arith.constant 0 : i32
    return %c0_i32, %c0_i32_0 : i32, i32
  }
  func.func @transform_6(%arg0: i32) -> (i32, i32) {
    %c0_i32 = arith.constant 0 : i32
    %c0_i32_0 = arith.constant 0 : i32
    %c0_i32_1 = arith.constant 0 : i32
    return %c0_i32, %c0_i32_0 : i32, i32
  }
  func.func @transform_7(%arg0: i32) -> (i32, i32) {
    %c0_i32 = arith.constant 0 : i32
    %c0_i32_0 = arith.constant 0 : i32
    return %c0_i32, %arg0 : i32, i32
  }
}

</mosaic_0001>

<bundles_post_ra>
// kernel: flow_model_forward.1
= control target key start
LH: loop header
LB: loop body
LE: loop exit
PB: predicated region body
PF: predicated region fallthrough
CT: control target
= control target key end

     0   :  { %s1773_s24 = smov 0   ;;  %s2093_s0 = inlined_call_operand.vmem [shape: f32[8,1024], index: 0, kind: input, shape index: {}]   ;;  %s2094_s1 = inlined_call_operand.vmem [shape: f32[128,8], index: 1, kind: input, shape index: {}]   ;;  %s2095_s2 = inlined_call_operand.vmem [shape: f32[128,1], index: 2, kind: input, shape index: {}]   ;;  %s2096_s3 = inlined_call_operand.vmem [shape: f32[128,128], index: 3, kind: input, shape index: {}]   ;;  %s2097_s4 = inlined_call_operand.vmem [shape: f32[128,1], index: 4, kind: input, shape index: {}]   ;;  %s2098_s5 = inlined_call_operand.vmem [shape: f32[8,128], index: 5, kind: input, shape index: {}]   ;;  %s2099_s6 = inlined_call_operand.vmem [shape: f32[8,1], index: 6, kind: input, shape index: {}]   ;;  %s2100_s7 = inlined_call_operand.vmem [shape: f32[8,1024], index: 7, kind: output, shape index: {}]  }
   0x1 LB: > { %s1540_s25 = sadd.s32 4294967295, %s1729_s24   ;;  %p1544_p0 = scmp.ge.s32.totalorder %s1729_s24, 1  ;;  %s1729_s24 = sphi %s1773_s24, %s17_s24  }
   0x2   : > { %p238_p1 = scmp.lt.s32.totalorder %s1729_s24, 3 }
   0x4   : > { %p239_p2 = pnand %p1544_p0, %p238_p1 }
   0x5   : > { %s1545_s26 = sshll.u32 (!%p239_p2), %s1540_s25, 2  ;;  %v1731_v0 = vmov (!%p239_p2), 0.0   ;;  %v1732_v1 = vmov (!%p239_p2), 0   ;;  %v302_v2 = vld [vmem:[%s2095_s2] sm:$0xff] (!%p239_p2)  ;;  %v303_v3 = vld [vmem:[%s2095_s2 + $0x8] sm:$0xff] (!%p239_p2)  ;;  %v304_v4 = vld [vmem:[%s2095_s2 + $0x10] sm:$0xff] (!%p239_p2) }
   0x6   : > { %242 = sbr.rel (%p239_p2) target bundleno = 801 (0x321), region = 48  ;;  %p271_p3 = scmp.lt.s32.totalorder (!%p239_p2), %s1545_s26, 7  ;;  %511 = vmatprep.mubr.f32.mxu0 (!%p239_p2), %v1731_v0  ;;  %672 = vmatprep.mubr.f32.mxu1 (!%p239_p2), %v1731_v0  ;;  %v282_v5 = vld [vmem:[%s2094_s1] sm:$0xff] (!%p239_p2)  ;;  %vm398_vm0 = vcmask (!%p239_p2), 64512   ;;  %v305_v11 = vld [vmem:[%s2095_s2 + $0x18] sm:$0xff] (!%p239_p2)  ;;  %v283_v12 = vld [vmem:[%s2094_s1 + $0x8] sm:$0xff] (!%p239_p2) }
   0x7   : > { %1721 = vset.pattern.permute.xlu0 (!%p239_p2), %v1732_v1  ;;  %1722 = vset.pattern.permute.xlu1 (!%p239_p2), %v1732_v1  ;;  %v306_v10 = vld [vmem:[%s2095_s2 + $0x20] sm:$0xff] (!%p239_p2)  ;;  %v308_v13 = vld [vmem:[%s2095_s2 + $0x30] sm:$0xff] (!%p239_p2)  ;;  %v307_v14 = vld [vmem:[%s2095_s2 + $0x28] sm:$0xff] (!%p239_p2) }
   0x8   : > { %320 = vperm.xlu0 (!%p239_p2), %1721, %v302_v2   ;;  %330 = vperm.xlu1 (!%p239_p2), %1722, %v304_v4   ;;  %v284_v15 = vld [vmem:[%s2094_s1 + $0x10] sm:$0xff] (!%p239_p2)  ;;  %v310_v16 = vld [vmem:[%s2095_s2 + $0x40] sm:$0xff] (!%p239_p2)  ;;  %v309_v17 = vld [vmem:[%s2095_s2 + $0x38] sm:$0xff] (!%p239_p2) }
   0x9   : > { %v285_v18 = vld [vmem:[%s2094_s1 + $0x18] sm:$0xff] (!%p239_p2)  ;;  %v312_v19 = vld [vmem:[%s2095_s2 + $0x50] sm:$0xff] (!%p239_p2)  ;;  %v311_v20 = vld [vmem:[%s2095_s2 + $0x48] sm:$0xff] (!%p239_p2) }
   0xa   : > { %v286_v21 = vld [vmem:[%s2094_s1 + $0x20] sm:$0xff] (!%p239_p2)  ;;  %v313_v23 = vld [vmem:[%s2095_s2 + $0x58] sm:$0xff] (!%p239_p2)  ;;  %v287_v24 = vld [vmem:[%s2094_s1 + $0x28] sm:$0xff] (!%p239_p2) }
   0xb   : > { %v314_v22 = vld [vmem:[%s2095_s2 + $0x60] sm:$0xff] (!%p239_p2)  ;;  %v316_v25 = vld [vmem:[%s2095_s2 + $0x70] sm:$0xff] (!%p239_p2)  ;;  %v315_v26 = vld [vmem:[%s2095_s2 + $0x68] sm:$0xff] (!%p239_p2) }
   0xc   : > { %325 = vperm.xlu0 (!%p239_p2), %1721, %v303_v3   ;;  %335 = vperm.xlu1 (!%p239_p2), %1722, %v305_v11   ;;  %v288_v27 = vld [vmem:[%s2094_s1 + $0x30] sm:$0xff] (!%p239_p2)  ;;  %v849_v28 = vld [vmem:[%s2097_s4] sm:$0xff] (!%p239_p2)  ;;  %v317_v29 = vld [vmem:[%s2095_s2 + $0x78] sm:$0xff] (!%p239_p2) }
   0xd   : > { %s2102_s26 = smov (!%p271_p3, %s1545_s26), 7  ;;  %v289_v30 = vld [vmem:[%s2094_s1 + $0x38] sm:$0xff]  ;;  %v851_v31 = vld [vmem:[%s2097_s4 + $0x10] sm:$0xff]  ;;  %v850_v32 = vld [vmem:[%s2097_s4 + $0x8] sm:$0xff] }
   0xe   : > { %s1546_s10 = sshll.u32 %s2102_s26, 3  ;;  %v290_v33 = vld [vmem:[%s2094_s1 + $0x40] sm:$0xff]  ;;  %v852_v35 = vld [vmem:[%s2097_s4 + $0x18] sm:$0xff]  ;;  %v291_v36 = vld [vmem:[%s2094_s1 + $0x48] sm:$0xff] }
   0xf   : > { %s274_s13 = scalar_lea.vmem %s2093_s0, %s1546_s10  ;;  %v853_v34 = vld [vmem:[%s2097_s4 + $0x20] sm:$0xff]  ;;  %v855_v37 = vld [vmem:[%s2097_s4 + $0x30] sm:$0xff]  ;;  %v854_v38 = vld [vmem:[%s2097_s4 + $0x28] sm:$0xff]  ;;  %s280_s22 = scalar_lea.vmem %s2100_s7, %s1546_s10 }
  0x10   : > { %v299_v6 = vld [vmem:[%s274_s13 + $0x8] sm:$0xff]  ;;  %v301_v7 = vld [vmem:[%s274_s13 + $0x18] sm:$0xff]  ;;  %v298_v8 = vld [vmem:[%s274_s13] sm:$0xff]  ;;  %340 = vperm.xlu0 %1721, %v306_v10   ;;  %345 = vperm.xlu1 %1722, %v307_v14  }
  0x11   : > { %447 = vmatprep.subr.mxu0 %v299_v6  ;;  %608 = vmatprep.subr.mxu1 %v301_v7  ;;  %v300_v9 = vld [vmem:[%s274_s13 + $0x10] sm:$0xff]  ;;  %v857_v40 = vld [vmem:[%s2097_s4 + $0x40] sm:$0xff]  ;;  %v856_v41 = vld [vmem:[%s2097_s4 + $0x38] sm:$0xff] }
  0x12   : > { %448 = vmatpush1.msra.mxu0 %v298_v8  ;;  %609 = vmatpush1.msra.mxu1 %v300_v9  ;;  %v292_v39 = vld [vmem:[%s2094_s1 + $0x50] sm:$0xff]  ;;  %v293_v42 = vld [vmem:[%s2094_s1 + $0x58] sm:$0xff]  ;;  %v858_v44 = vld [vmem:[%s2097_s4 + $0x48] sm:$0xff] }
  0x13   : > { %1549 = vmatmul.mubr.msk.f32.vlgmr.msra.gmra.mrb[0].mxu0 %vm398_vm0, %v282_v5  ;;  %1565 = vmatmul.mubr.msk.f32.vlgmr.msra.gmra.mrb[0].mxu1 %vm398_vm0, %v282_v5  ;;  %v859_v43 = vld [vmem:[%s2097_s4 + $0x50] sm:$0xff]  ;;  %v294_v45 = vld [vmem:[%s2094_s1 + $0x60] sm:$0xff]  ;;  %v860_v47 = vld [vmem:[%s2097_s4 + $0x58] sm:$0xff] }
  0x14   : > { %517 = vmatprep.mubr.f32.mxu0 %v1731_v0  ;;  %678 = vmatprep.mubr.f32.mxu1 %v1731_v0  ;;  %v861_v46 = vld [vmem:[%s2097_s4 + $0x60] sm:$0xff]  ;;  %v295_v48 = vld [vmem:[%s2094_s1 + $0x68] sm:$0xff]  ;;  %v863_v49 = vld [vmem:[%s2097_s4 + $0x70] sm:$0xff] }
  0x15   : > { %350 = vperm.xlu0 %1721, %v308_v13   ;;  %355 = vperm.xlu1 %1722, %v309_v17   ;;  %v862_v50 = vld [vmem:[%s2097_s4 + $0x68] sm:$0xff]  ;;  %v296_v51 = vld [vmem:[%s2094_s1 + $0x70] sm:$0xff]  ;;  %v1332_v52 = vld [vmem:[%s2099_s6] sm:$0xff] }
  0x16   : > { %v864_v53 = vld [vmem:[%s2097_s4 + $0x78] sm:$0xff] }
  0x17   : > { %1550 = vmatmul.mubr.msk.f32.gmra.mrb[2].mxu0 %vm398_vm0, %v283_v12  ;;  %1566 = vmatmul.mubr.msk.f32.gmra.mrb[2].mxu1 %vm398_vm0, %v283_v12  ;;  %v297_v54 = vld [vmem:[%s2094_s1 + $0x78] sm:$0xff] }
  0x18   : > { %523 = vmatprep.mubr.f32.mxu0 %v1731_v0  ;;  %684 = vmatprep.mubr.f32.mxu1 %v1731_v0 }
  0x19   : > { %360 = vperm.xlu0 %1721, %v310_v16   ;;  %365 = vperm.xlu1 %1722, %v311_v20  }
  0x1b   : > { %1551 = vmatmul.mubr.msk.f32.gmra.mrb[4].mxu0 %vm398_vm0, %v284_v15  ;;  %1567 = vmatmul.mubr.msk.f32.gmra.mrb[4].mxu1 %vm398_vm0, %v284_v15 }
  0x1c   : > { %529 = vmatprep.mubr.f32.mxu0 %v1731_v0  ;;  %690 = vmatprep.mubr.f32.mxu1 %v1731_v0 }
  0x1d   : > { %370 = vperm.xlu0 %1721, %v312_v19   ;;  %375 = vperm.xlu1 %1722, %v313_v23  }
  0x1f   : > { %1552 = vmatmul.mubr.msk.f32.gmra.mrb[6].mxu0 %vm398_vm0, %v285_v18  ;;  %1568 = vmatmul.mubr.msk.f32.gmra.mrb[6].mxu1 %vm398_vm0, %v285_v18 }
  0x20   : > { %535 = vmatprep.mubr.f32.mxu0 %v1731_v0  ;;  %696 = vmatprep.mubr.f32.mxu1 %v1731_v0 }
  0x21   : > { %380 = vperm.xlu0 %1721, %v314_v22   ;;  %385 = vperm.xlu1 %1722, %v315_v26  }
  0x23   : > { %1553 = vmatmul.mubr.msk.f32.gmra.mrb[8].mxu0 %vm398_vm0, %v286_v21  ;;  %1569 = vmatmul.mubr.msk.f32.gmra.mrb[8].mxu1 %vm398_vm0, %v286_v21 }
  0x24   : > { %541 = vmatprep.mubr.f32.mxu0 %v1731_v0  ;;  %702 = vmatprep.mubr.f32.mxu1 %v1731_v0 }
  0x25   : > { %390 = vperm.xlu0 %1721, %v316_v25   ;;  %395 = vperm.xlu1 %1722, %v317_v29  }
  0x27   : > { %1554 = vmatmul.mubr.msk.f32.gmra.mrb[10].mxu0 %vm398_vm0, %v287_v24  ;;  %1570 = vmatmul.mubr.msk.f32.gmra.mrb[10].mxu1 %vm398_vm0, %v287_v24 }
  0x28   : > { %547 = vmatprep.mubr.f32.mxu0 %v1731_v0  ;;  %708 = vmatprep.mubr.f32.mxu1 %v1731_v0 }
  0x29   : > { %867 = vperm.xlu0 %1721, %v849_v28   ;;  %872 = vperm.xlu1 %1722, %v850_v32  }
  0x2b   : > { %1555 = vmatmul.mubr.msk.f32.gmra.mrb[12].mxu0 %vm398_vm0, %v288_v27  ;;  %1571 = vmatmul.mubr.msk.f32.gmra.mrb[12].mxu1 %vm398_vm0, %v288_v27 }
  0x2c   : > { %553 = vmatprep.mubr.f32.mxu0 %v1731_v0  ;;  %714 = vmatprep.mubr.f32.mxu1 %v1731_v0 }
  0x2d   : > { %877 = vperm.xlu0 %1721, %v851_v31   ;;  %882 = vperm.xlu1 %1722, %v852_v35  }
  0x2f   : > { %1556 = vmatmul.mubr.msk.f32.gmra.mrb[14].mxu0 %vm398_vm0, %v289_v30  ;;  %1572 = vmatmul.mubr.msk.f32.gmra.mrb[14].mxu1 %vm398_vm0, %v289_v30 }
  0x30   : > { %559 = vmatprep.mubr.f32.mxu0 %v1731_v0  ;;  %720 = vmatprep.mubr.f32.mxu1 %v1731_v0 }
  0x31   : > { %887 = vperm.xlu0 %1721, %v853_v34   ;;  %892 = vperm.xlu1 %1722, %v854_v38  }
  0x33   : > { %1557 = vmatmul.mubr.msk.f32.gmra.mrb[16].mxu0 %vm398_vm0, %v290_v33  ;;  %1573 = vmatmul.mubr.msk.f32.gmra.mrb[16].mxu1 %vm398_vm0, %v290_v33 }
  0x34   : > { %565 = vmatprep.mubr.f32.mxu0 %v1731_v0  ;;  %726 = vmatprep.mubr.f32.mxu1 %v1731_v0 }
  0x35   : > { %897 = vperm.xlu0 %1721, %v855_v37   ;;  %902 = vperm.xlu1 %1722, %v856_v41  }
  0x37   : > { %1558 = vmatmul.mubr.msk.f32.gmra.mrb[18].mxu0 %vm398_vm0, %v291_v36  ;;  %1574 = vmatmul.mubr.msk.f32.gmra.mrb[18].mxu1 %vm398_vm0, %v291_v36 }
  0x38   : > { %571 = vmatprep.mubr.f32.mxu0 %v1731_v0  ;;  %732 = vmatprep.mubr.f32.mxu1 %v1731_v0 }
  0x39   : > { %907 = vperm.xlu0 %1721, %v857_v40   ;;  %912 = vperm.xlu1 %1722, %v858_v44  }
  0x3b   : > { %1559 = vmatmul.mubr.msk.f32.gmra.mrb[20].mxu0 %vm398_vm0, %v292_v39  ;;  %1575 = vmatmul.mubr.msk.f32.gmra.mrb[20].mxu1 %vm398_vm0, %v292_v39 }
  0x3c   : > { %577 = vmatprep.mubr.f32.mxu0 %v1731_v0  ;;  %738 = vmatprep.mubr.f32.mxu1 %v1731_v0 }
  0x3d   : > { %917 = vperm.xlu0 %1721, %v859_v43   ;;  %922 = vperm.xlu1 %1722, %v860_v47  }
  0x3f   : > { %1560 = vmatmul.mubr.msk.f32.gmra.mrb[22].mxu0 %vm398_vm0, %v293_v42  ;;  %1576 = vmatmul.mubr.msk.f32.gmra.mrb[22].mxu1 %vm398_vm0, %v293_v42 }
  0x40   : > { %583 = vmatprep.mubr.f32.mxu0 %v1731_v0  ;;  %744 = vmatprep.mubr.f32.mxu1 %v1731_v0 }
  0x41   : > { %927 = vperm.xlu0 %1721, %v861_v46   ;;  %932 = vperm.xlu1 %1722, %v862_v50  }
  0x43   : > { %1561 = vmatmul.mubr.msk.f32.gmra.mrb[24].mxu0 %vm398_vm0, %v294_v45  ;;  %1577 = vmatmul.mubr.msk.f32.gmra.mrb[24].mxu1 %vm398_vm0, %v294_v45 }
  0x44   : > { %589 = vmatprep.mubr.f32.mxu0 %v1731_v0  ;;  %750 = vmatprep.mubr.f32.mxu1 %v1731_v0 }
  0x45   : > { %937 = vperm.xlu0 %1721, %v863_v49   ;;  %942 = vperm.xlu1 %1722, %v864_v53  }
  0x47   : > { %1562 = vmatmul.mubr.msk.f32.gmra.mrb[26].mxu0 %vm398_vm0, %v295_v48  ;;  %1578 = vmatmul.mubr.msk.f32.gmra.mrb[26].mxu1 %vm398_vm0, %v295_v48 }
  0x48   : > { %595 = vmatprep.mubr.f32.mxu0 %v1731_v0  ;;  %756 = vmatprep.mubr.f32.mxu1 %v1731_v0 }
  0x49   : > { %1335 = vperm.xlu0 %1721, %v1332_v52  }
  0x4b   : > { %1563 = vmatmul.mubr.msk.f32.gmra.mrb[28].mxu0 %vm398_vm0, %v296_v51  ;;  %1579 = vmatmul.mubr.msk.f32.gmra.mrb[28].mxu1 %vm398_vm0, %v296_v51 }
  0x4c   : > { %601 = vmatprep.mubr.f32.mxu0 %v1731_v0  ;;  %762 = vmatprep.mubr.f32.mxu1 %v1731_v0 }
  0x4f   : > { %1564 = vmatmul.mubr.msk.f32.gmra.mrb[30].mxu0 %vm398_vm0, %v297_v54  ;;  %1580 = vmatmul.mubr.msk.f32.gmra.mrb[30].mxu1 %vm398_vm0, %v297_v54 }
  0x50   : > { %1009 = vmatprep.mubr.f32.mxu0 %v1731_v0  ;;  %1170 = vmatprep.mubr.f32.mxu1 %v1731_v0 }
  0x87   : > { %v321_v55 = vpop.permute.xlu0 %320  ;;  %v331_v61 = vpop.permute.xlu1 %330 }
  0x8b   : > { %v326_v60 = vpop.permute.xlu0 %325  ;;  %v336_v27 = vpop.permute.xlu1 %335 }
  0x8f   : > { %v341_v54 = vpop.permute.xlu0 %340 }
  0xe6   : > { %v513_v56 = vpop.f32.mrb[0].mxu0  ;;  %v674_v57 = vpop.f32.mrb[0].mxu1 }
  0xe7   : > { %v515_v58 = vpop.f32.mrb[1].mxu0  ;;  %v676_v59 = vpop.f32.mrb[1].mxu1  ;;  %v514_v62 = vadd.f32 %v513_v56, %v321_v55  ;;  %v675_v63 = vadd.f32 %v674_v57, %v321_v55 }
  0xe8   : > { %v516_v1 = vadd.f32 %v515_v58, %v321_v55  ;;  %v677_v2 = vadd.f32 %v676_v59, %v321_v55  ;;  %v346_v57 = vpop.permute.xlu1 %345 }
  0xe9   : > { %v769_v11 = vmax.f32 %v514_v62, 0.0  ;;  %v771_v12 = vmax.f32 %v675_v63, 0.0 }
  0xea   : > { %v519_v3 = vpop.f32.mrb[2].mxu0  ;;  %v680_v4 = vpop.f32.mrb[2].mxu1  ;;  %v770_v15 = vmax.f32 %v516_v1, 0.0  ;;  %v772_v16 = vmax.f32 %v677_v2, 0.0 }
  0xeb   : > { %v520_v5 = vadd.f32 %v519_v3, %v326_v60  ;;  %v681_v6 = vadd.f32 %v680_v4, %v326_v60  ;;  %v521_v7 = vpop.f32.mrb[3].mxu0  ;;  %v682_v8 = vpop.f32.mrb[3].mxu1 }
  0xec   : > { %v522_v9 = vadd.f32 %v521_v7, %v326_v60  ;;  %v683_v10 = vadd.f32 %v682_v8, %v326_v60 }
  0xed   : > { %v773_v13 = vmax.f32 %v520_v5, 0.0  ;;  %v775_v14 = vmax.f32 %v681_v6, 0.0 }
  0xee   : > { %v774_v17 = vmax.f32 %v522_v9, 0.0  ;;  %v776_v18 = vmax.f32 %v683_v10, 0.0  ;;  %v525_v19 = vpop.f32.mrb[4].mxu0  ;;  %v686_v20 = vpop.f32.mrb[4].mxu1 }
  0xef   : > { %v1585_v21 = vpack.c.bf16 %v773_v13, %v769_v11  ;;  %v1617_v22 = vpack.c.bf16 %v775_v14, %v771_v12  ;;  %v527_v23 = vpop.f32.mrb[5].mxu0  ;;  %v688_v24 = vpop.f32.mrb[5].mxu1  ;;  %v526_v28 = vadd.f32 %v525_v19, %v331_v61  ;;  %v687_v29 = vadd.f32 %v686_v20, %v331_v61 }
  0xf0   : > { %v1583_v25 = vpack.c.bf16 %v774_v17, %v770_v15  ;;  %v1615_v26 = vpack.c.bf16 %v776_v18, %v772_v16  ;;  %v528_v30 = vadd.f32 %v527_v23, %v331_v61  ;;  %v689_v31 = vadd.f32 %v688_v24, %v331_v61  ;;  %v356_v24 = vpop.permute.xlu1 %355 }
  0xf1   : > { %v777_v40 = vmax.f32 %v526_v28, 0.0  ;;  %v779_v41 = vmax.f32 %v687_v29, 0.0 }
  0xf2   : > { %v531_v32 = vpop.f32.mrb[6].mxu0  ;;  %v692_v33 = vpop.f32.mrb[6].mxu1  ;;  %1584 = vmatprep.subr.bf16.mxu0 %v1583_v25  ;;  %1616 = vmatprep.subr.bf16.mxu1 %v1615_v26  ;;  %v778_v44 = vmax.f32 %v528_v30, 0.0  ;;  %v780_v45 = vmax.f32 %v689_v31, 0.0 }
  0xf3   : > { %v532_v34 = vadd.f32 %v531_v32, %v336_v27  ;;  %v693_v35 = vadd.f32 %v692_v33, %v336_v27  ;;  %v533_v36 = vpop.f32.mrb[7].mxu0  ;;  %v694_v37 = vpop.f32.mrb[7].mxu1  ;;  %1586 = vmatpush1.bf16.msra.mxu0 %v1585_v21  ;;  %1618 = vmatpush1.bf16.msra.mxu1 %v1617_v22 }
  0xf4   : > { %v534_v38 = vadd.f32 %v533_v36, %v336_v27  ;;  %v695_v39 = vadd.f32 %v694_v37, %v336_v27  ;;  %v351_v21 = vpop.permute.xlu0 %350 }
  0xf5   : > { %v781_v42 = vmax.f32 %v532_v34, 0.0  ;;  %v783_v43 = vmax.f32 %v693_v35, 0.0 }
  0xf6   : > { %v782_v46 = vmax.f32 %v534_v38, 0.0  ;;  %v784_v47 = vmax.f32 %v695_v39, 0.0  ;;  %v537_v48 = vpop.f32.mrb[8].mxu0  ;;  %v698_v49 = vpop.f32.mrb[8].mxu1 }
  0xf7   : > { %v1589_v50 = vpack.c.bf16 %v781_v42, %v777_v40  ;;  %v1621_v51 = vpack.c.bf16 %v783_v43, %v779_v41  ;;  %v539_v52 = vpop.f32.mrb[9].mxu0  ;;  %v700_v53 = vpop.f32.mrb[9].mxu1  ;;  %v538_v58 = vadd.f32 %v537_v48, %v341_v54  ;;  %v699_v59 = vadd.f32 %v698_v49, %v341_v54 }
  0xf8   : > { %v1587_v55 = vpack.c.bf16 %v782_v46, %v778_v44  ;;  %v1619_v56 = vpack.c.bf16 %v784_v47, %v780_v45  ;;  %v540_v60 = vadd.f32 %v539_v52, %v341_v54  ;;  %v701_v61 = vadd.f32 %v700_v53, %v341_v54  ;;  %v366_v54 = vpop.permute.xlu1 %365 }
  0xf9   : > { %v785_v7 = vmax.f32 %v538_v58, 0.0  ;;  %v787_v8 = vmax.f32 %v699_v59, 0.0 }
  0xfa   : > { %v543_v62 = vpop.f32.mrb[10].mxu0  ;;  %v704_v63 = vpop.f32.mrb[10].mxu1  ;;  %1588 = vmatprep.subr.bf16.mxu0 %v1587_v55  ;;  %1620 = vmatprep.subr.bf16.mxu1 %v1619_v56  ;;  %v786_v11 = vmax.f32 %v540_v60, 0.0  ;;  %v788_v12 = vmax.f32 %v701_v61, 0.0 }
  0xfb   : > { %v544_v1 = vadd.f32 %v543_v62, %v346_v57  ;;  %v705_v2 = vadd.f32 %v704_v63, %v346_v57  ;;  %v545_v3 = vpop.f32.mrb[11].mxu0  ;;  %v706_v4 = vpop.f32.mrb[11].mxu1  ;;  %1590 = vmatpush1.bf16.msra.mxu0 %v1589_v50  ;;  %1622 = vmatpush1.bf16.msra.mxu1 %v1621_v51 }
  0xfc   : > { %v546_v5 = vadd.f32 %v545_v3, %v346_v57  ;;  %v707_v6 = vadd.f32 %v706_v4, %v346_v57  ;;  %v361_v51 = vpop.permute.xlu0 %360 }
  0xfd   : > { %v789_v9 = vmax.f32 %v544_v1, 0.0  ;;  %v791_v10 = vmax.f32 %v705_v2, 0.0 }
  0xfe   : > { %v790_v13 = vmax.f32 %v546_v5, 0.0  ;;  %v792_v14 = vmax.f32 %v707_v6, 0.0  ;;  %v549_v15 = vpop.f32.mrb[12].mxu0  ;;  %v710_v16 = vpop.f32.mrb[12].mxu1 }
  0xff   : > { %v1593_v17 = vpack.c.bf16 %v789_v9, %v785_v7  ;;  %v1625_v18 = vpack.c.bf16 %v791_v10, %v787_v8  ;;  %v551_v19 = vpop.f32.mrb[13].mxu0  ;;  %v712_v20 = vpop.f32.mrb[13].mxu1  ;;  %v550_v25 = vadd.f32 %v549_v15, %v351_v21  ;;  %v711_v26 = vadd.f32 %v710_v16, %v351_v21 }
 0x100   : > { %v1591_v22 = vpack.c.bf16 %v790_v13, %v786_v11  ;;  %v1623_v23 = vpack.c.bf16 %v792_v14, %v788_v12  ;;  %v552_v27 = vadd.f32 %v551_v19, %v351_v21  ;;  %v713_v28 = vadd.f32 %v712_v20, %v351_v21  ;;  %v376_v21 = vpop.permute.xlu1 %375 }
 0x101   : > { %v793_v37 = vmax.f32 %v550_v25, 0.0  ;;  %v795_v38 = vmax.f32 %v711_v26, 0.0 }
 0x102   : > { %v555_v29 = vpop.f32.mrb[14].mxu0  ;;  %v716_v30 = vpop.f32.mrb[14].mxu1  ;;  %1592 = vmatprep.subr.bf16.mxu0 %v1591_v22  ;;  %1624 = vmatprep.subr.bf16.mxu1 %v1623_v23  ;;  %v794_v41 = vmax.f32 %v552_v27, 0.0  ;;  %v796_v42 = vmax.f32 %v713_v28, 0.0 }
 0x103   : > { %v556_v31 = vadd.f32 %v555_v29, %v356_v24  ;;  %v717_v32 = vadd.f32 %v716_v30, %v356_v24  ;;  %v557_v33 = vpop.f32.mrb[15].mxu0  ;;  %v718_v34 = vpop.f32.mrb[15].mxu1  ;;  %1594 = vmatpush1.bf16.msra.mxu0 %v1593_v17  ;;  %1626 = vmatpush1.bf16.msra.mxu1 %v1625_v18 }
 0x104   : > { %v558_v35 = vadd.f32 %v557_v33, %v356_v24  ;;  %v719_v36 = vadd.f32 %v718_v34, %v356_v24  ;;  %v371_v18 = vpop.permute.xlu0 %370 }
 0x105   : > { %v797_v39 = vmax.f32 %v556_v31, 0.0  ;;  %v799_v40 = vmax.f32 %v717_v32, 0.0 }
 0x106   : > { %v798_v43 = vmax.f32 %v558_v35, 0.0  ;;  %v800_v44 = vmax.f32 %v719_v36, 0.0  ;;  %v561_v45 = vpop.f32.mrb[16].mxu0  ;;  %v722_v46 = vpop.f32.mrb[16].mxu1 }
 0x107   : > { %v1597_v47 = vpack.c.bf16 %v797_v39, %v793_v37  ;;  %v1629_v48 = vpack.c.bf16 %v799_v40, %v795_v38  ;;  %v563_v49 = vpop.f32.mrb[17].mxu0  ;;  %v724_v50 = vpop.f32.mrb[17].mxu1  ;;  %v562_v55 = vadd.f32 %v561_v45, %v361_v51  ;;  %v723_v56 = vadd.f32 %v722_v46, %v361_v51 }
 0x108   : > { %v1595_v52 = vpack.c.bf16 %v798_v43, %v794_v41  ;;  %v1627_v53 = vpack.c.bf16 %v800_v44, %v796_v42  ;;  %v564_v57 = vadd.f32 %v563_v49, %v361_v51  ;;  %v725_v58 = vadd.f32 %v724_v50, %v361_v51  ;;  %v386_v51 = vpop.permute.xlu1 %385 }
 0x109   : > { %v801_v4 = vmax.f32 %v562_v55, 0.0  ;;  %v803_v5 = vmax.f32 %v723_v56, 0.0 }
 0x10a   : > { %v567_v59 = vpop.f32.mrb[18].mxu0  ;;  %v728_v60 = vpop.f32.mrb[18].mxu1  ;;  %1596 = vmatprep.subr.bf16.mxu0 %v1595_v52  ;;  %1628 = vmatprep.subr.bf16.mxu1 %v1627_v53  ;;  %v802_v8 = vmax.f32 %v564_v57, 0.0  ;;  %v804_v9 = vmax.f32 %v725_v58, 0.0 }
 0x10b   : > { %v568_v61 = vadd.f32 %v567_v59, %v366_v54  ;;  %v729_v62 = vadd.f32 %v728_v60, %v366_v54  ;;  %v569_v63 = vpop.f32.mrb[19].mxu0  ;;  %v730_v1 = vpop.f32.mrb[19].mxu1  ;;  %1598 = vmatpush1.bf16.msra.mxu0 %v1597_v47  ;;  %1630 = vmatpush1.bf16.msra.mxu1 %v1629_v48 }
 0x10c   : > { %v570_v2 = vadd.f32 %v569_v63, %v366_v54  ;;  %v731_v3 = vadd.f32 %v730_v1, %v366_v54  ;;  %v381_v48 = vpop.permute.xlu0 %380 }
 0x10d   : > { %v805_v6 = vmax.f32 %v568_v61, 0.0  ;;  %v807_v7 = vmax.f32 %v729_v62, 0.0 }
 0x10e   : > { %v806_v10 = vmax.f32 %v570_v2, 0.0  ;;  %v808_v11 = vmax.f32 %v731_v3, 0.0  ;;  %v573_v12 = vpop.f32.mrb[20].mxu0  ;;  %v734_v13 = vpop.f32.mrb[20].mxu1 }
 0x10f   : > { %v1601_v14 = vpack.c.bf16 %v805_v6, %v801_v4  ;;  %v1633_v15 = vpack.c.bf16 %v807_v7, %v803_v5  ;;  %v575_v16 = vpop.f32.mrb[21].mxu0  ;;  %v736_v17 = vpop.f32.mrb[21].mxu1  ;;  %v574_v22 = vadd.f32 %v573_v12, %v371_v18  ;;  %v735_v23 = vadd.f32 %v734_v13, %v371_v18 }
 0x110   : > { %v1599_v19 = vpack.c.bf16 %v806_v10, %v802_v8  ;;  %v1631_v20 = vpack.c.bf16 %v808_v11, %v804_v9  ;;  %v576_v24 = vadd.f32 %v575_v16, %v371_v18  ;;  %v737_v25 = vadd.f32 %v736_v17, %v371_v18  ;;  %v396_v18 = vpop.permute.xlu1 %395 }
 0x111   : > { %v809_v34 = vmax.f32 %v574_v22, 0.0  ;;  %v811_v35 = vmax.f32 %v735_v23, 0.0 }
 0x112   : > { %v579_v26 = vpop.f32.mrb[22].mxu0  ;;  %v740_v27 = vpop.f32.mrb[22].mxu1  ;;  %1600 = vmatprep.subr.bf16.mxu0 %v1599_v19  ;;  %1632 = vmatprep.subr.bf16.mxu1 %v1631_v20  ;;  %v810_v38 = vmax.f32 %v576_v24, 0.0  ;;  %v812_v39 = vmax.f32 %v737_v25, 0.0 }
 0x113   : > { %v580_v28 = vadd.f32 %v579_v26, %v376_v21  ;;  %v741_v29 = vadd.f32 %v740_v27, %v376_v21  ;;  %v581_v30 = vpop.f32.mrb[23].mxu0  ;;  %v742_v31 = vpop.f32.mrb[23].mxu1  ;;  %1602 = vmatpush1.bf16.msra.mxu0 %v1601_v14  ;;  %1634 = vmatpush1.bf16.msra.mxu1 %v1633_v15 }
 0x114   : > { %v582_v32 = vadd.f32 %v581_v30, %v376_v21  ;;  %v743_v33 = vadd.f32 %v742_v31, %v376_v21  ;;  %v391_v15 = vpop.permute.xlu0 %390 }
 0x115   : > { %v813_v36 = vmax.f32 %v580_v28, 0.0  ;;  %v815_v37 = vmax.f32 %v741_v29, 0.0 }
 0x116   : > { %v814_v40 = vmax.f32 %v582_v32, 0.0  ;;  %v816_v41 = vmax.f32 %v743_v33, 0.0  ;;  %v585_v42 = vpop.f32.mrb[24].mxu0  ;;  %v746_v43 = vpop.f32.mrb[24].mxu1 }
 0x117   : > { %v1605_v44 = vpack.c.bf16 %v813_v36, %v809_v34  ;;  %v1637_v45 = vpack.c.bf16 %v815_v37, %v811_v35  ;;  %v587_v46 = vpop.f32.mrb[25].mxu0  ;;  %v748_v47 = vpop.f32.mrb[25].mxu1  ;;  %v586_v52 = vadd.f32 %v585_v42, %v381_v48  ;;  %v747_v53 = vadd.f32 %v746_v43, %v381_v48  ;;  %v833_v43 = vld [vmem:[%s2096_s3] sm:$0xff] }
 0x118   : > { %v1603_v49 = vpack.c.bf16 %v814_v40, %v810_v38  ;;  %v1635_v50 = vpack.c.bf16 %v816_v41, %v812_v39  ;;  %v588_v54 = vadd.f32 %v587_v46, %v381_v48  ;;  %v749_v55 = vadd.f32 %v748_v47, %v381_v48  ;;  %v836_v46 = vld [vmem:[%s2096_s3 + $0x18] sm:$0xff]  ;;  %v837_v47 = vld [vmem:[%s2096_s3 + $0x20] sm:$0xff]  ;;  %v838_v48 = vld [vmem:[%s2096_s3 + $0x28] sm:$0xff] }
 0x119   : > { %v817_v1 = vmax.f32 %v586_v52, 0.0  ;;  %v819_v2 = vmax.f32 %v747_v53, 0.0  ;;  %v842_v52 = vld [vmem:[%s2096_s3 + $0x48] sm:$0xff]  ;;  %v843_v53 = vld [vmem:[%s2096_s3 + $0x50] sm:$0xff] }
 0x11a   : > { %v591_v56 = vpop.f32.mrb[26].mxu0  ;;  %v752_v57 = vpop.f32.mrb[26].mxu1  ;;  %1604 = vmatprep.subr.bf16.mxu0 %v1603_v49  ;;  %1636 = vmatprep.subr.bf16.mxu1 %v1635_v50  ;;  %v818_v5 = vmax.f32 %v588_v54, 0.0  ;;  %v820_v6 = vmax.f32 %v749_v55, 0.0  ;;  %v839_v49 = vld [vmem:[%s2096_s3 + $0x30] sm:$0xff]  ;;  %v840_v50 = vld [vmem:[%s2096_s3 + $0x38] sm:$0xff] }
 0x11b   : > { %v592_v58 = vadd.f32 %v591_v56, %v386_v51  ;;  %v753_v59 = vadd.f32 %v752_v57, %v386_v51  ;;  %v593_v60 = vpop.f32.mrb[27].mxu0  ;;  %v754_v61 = vpop.f32.mrb[27].mxu1  ;;  %1606 = vmatpush1.bf16.msra.mxu0 %v1605_v44  ;;  %1638 = vmatpush1.bf16.msra.mxu1 %v1637_v45  ;;  %v834_v44 = vld [vmem:[%s2096_s3 + $0x8] sm:$0xff]  ;;  %v835_v45 = vld [vmem:[%s2096_s3 + $0x10] sm:$0xff]  ;;  %v844_v54 = vld [vmem:[%s2096_s3 + $0x58] sm:$0xff] }
 0x11c   : > { %v594_v62 = vadd.f32 %v593_v60, %v386_v51  ;;  %v755_v63 = vadd.f32 %v754_v61, %v386_v51  ;;  %v841_v51 = vld [vmem:[%s2096_s3 + $0x40] sm:$0xff]  ;;  %v846_v56 = vld [vmem:[%s2096_s3 + $0x68] sm:$0xff]  ;;  %v847_v57 = vld [vmem:[%s2096_s3 + $0x70] sm:$0xff] }
 0x11d   : > { %v821_v3 = vmax.f32 %v592_v58, 0.0  ;;  %v823_v4 = vmax.f32 %v753_v59, 0.0  ;;  %v845_v55 = vld [vmem:[%s2096_s3 + $0x60] sm:$0xff]  ;;  %v848_v58 = vld [vmem:[%s2096_s3 + $0x78] sm:$0xff] }
 0x11e   : > { %v822_v7 = vmax.f32 %v594_v62, 0.0  ;;  %v824_v8 = vmax.f32 %v755_v63, 0.0  ;;  %v597_v9 = vpop.f32.mrb[28].mxu0  ;;  %v758_v10 = vpop.f32.mrb[28].mxu1 }
 0x11f   : > { %v1609_v11 = vpack.c.bf16 %v821_v3, %v817_v1  ;;  %v1641_v12 = vpack.c.bf16 %v823_v4, %v819_v2  ;;  %v599_v13 = vpop.f32.mrb[29].mxu0  ;;  %v760_v14 = vpop.f32.mrb[29].mxu1  ;;  %v598_v19 = vadd.f32 %v597_v9, %v391_v15  ;;  %v759_v20 = vadd.f32 %v758_v10, %v391_v15 }
 0x120   : > { %v1607_v16 = vpack.c.bf16 %v822_v7, %v818_v5  ;;  %v1639_v17 = vpack.c.bf16 %v824_v8, %v820_v6  ;;  %v600_v21 = vadd.f32 %v599_v13, %v391_v15  ;;  %v761_v22 = vadd.f32 %v760_v14, %v391_v15  ;;  %v868_v63 = vpop.permute.xlu0 %867  ;;  %v873_v1 = vpop.permute.xlu1 %872 }
 0x121   : > { %v825_v31 = vmax.f32 %v598_v19, 0.0  ;;  %v827_v32 = vmax.f32 %v759_v20, 0.0 }
 0x122   : > { %v603_v23 = vpop.f32.mrb[30].mxu0  ;;  %v764_v24 = vpop.f32.mrb[30].mxu1  ;;  %1608 = vmatprep.subr.bf16.mxu0 %v1607_v16  ;;  %1640 = vmatprep.subr.bf16.mxu1 %v1639_v17  ;;  %v826_v35 = vmax.f32 %v600_v21, 0.0  ;;  %v828_v36 = vmax.f32 %v761_v22, 0.0 }
 0x123   : > { %v604_v25 = vadd.f32 %v603_v23, %v396_v18  ;;  %v765_v26 = vadd.f32 %v764_v24, %v396_v18  ;;  %v605_v27 = vpop.f32.mrb[31].mxu0  ;;  %v766_v28 = vpop.f32.mrb[31].mxu1  ;;  %1610 = vmatpush1.bf16.msra.mxu0 %v1609_v11  ;;  %1642 = vmatpush1.bf16.msra.mxu1 %v1641_v12 }
 0x124   : > { %v606_v29 = vadd.f32 %v605_v27, %v396_v18  ;;  %v767_v30 = vadd.f32 %v766_v28, %v396_v18  ;;  %v878_v27 = vpop.permute.xlu0 %877 }
 0x125   : > { %v829_v33 = vmax.f32 %v604_v25, 0.0  ;;  %v831_v34 = vmax.f32 %v765_v26, 0.0 }
 0x126   : > { %v830_v37 = vmax.f32 %v606_v29, 0.0  ;;  %v832_v38 = vmax.f32 %v767_v30, 0.0  ;;  %v883_v30 = vpop.permute.xlu1 %882 }
 0x127   : > { %v1613_v39 = vpack.c.bf16 %v829_v33, %v825_v31  ;;  %v1645_v40 = vpack.c.bf16 %v831_v34, %v827_v32 }
 0x128   : > { %v1611_v41 = vpack.c.bf16 %v830_v37, %v826_v35  ;;  %v1643_v42 = vpack.c.bf16 %v832_v38, %v828_v36 }
 0x12a   : > { %1612 = vmatprep.subr.bf16.mxu0 %v1611_v41  ;;  %1644 = vmatprep.subr.bf16.mxu1 %v1643_v42 }
 0x12b   : > { %1614 = vmatpush1.bf16.msra.mxu0 %v1613_v39  ;;  %1646 = vmatpush1.bf16.msra.mxu1 %v1645_v40 }
 0x12e   : > { %1010 = vmatmul.mubr.f32.vlgmr.msra.gmra.mrb[32].mxu0 %v833_v43  ;;  %1171 = vmatmul.mubr.f32.vlgmr.msra.gmra.mrb[32].mxu1 %v833_v43 }
 0x12f   : > { %1015 = vmatprep.mubr.f32.mxu0 %v1731_v0  ;;  %1176 = vmatprep.mubr.f32.mxu1 %v1731_v0 }
 0x132   : > { %1016 = vmatmul.mubr.f32.gmra.mrb[34].mxu0 %v834_v44  ;;  %1177 = vmatmul.mubr.f32.gmra.mrb[34].mxu1 %v834_v44 }
 0x133   : > { %1021 = vmatprep.mubr.f32.mxu0 %v1731_v0  ;;  %1182 = vmatprep.mubr.f32.mxu1 %v1731_v0 }
 0x136   : > { %1022 = vmatmul.mubr.f32.gmra.mrb[36].mxu0 %v835_v45  ;;  %1183 = vmatmul.mubr.f32.gmra.mrb[36].mxu1 %v835_v45 }
 0x137   : > { %1027 = vmatprep.mubr.f32.mxu0 %v1731_v0  ;;  %1188 = vmatprep.mubr.f32.mxu1 %v1731_v0 }
 0x13a   : > { %1028 = vmatmul.mubr.f32.gmra.mrb[38].mxu0 %v836_v46  ;;  %1189 = vmatmul.mubr.f32.gmra.mrb[38].mxu1 %v836_v46 }
 0x13b   : > { %1033 = vmatprep.mubr.f32.mxu0 %v1731_v0  ;;  %1194 = vmatprep.mubr.f32.mxu1 %v1731_v0 }
 0x13e   : > { %1034 = vmatmul.mubr.f32.gmra.mrb[40].mxu0 %v837_v47  ;;  %1195 = vmatmul.mubr.f32.gmra.mrb[40].mxu1 %v837_v47 }
 0x13f   : > { %1039 = vmatprep.mubr.f32.mxu0 %v1731_v0  ;;  %1200 = vmatprep.mubr.f32.mxu1 %v1731_v0 }
 0x142   : > { %1040 = vmatmul.mubr.f32.gmra.mrb[42].mxu0 %v838_v48  ;;  %1201 = vmatmul.mubr.f32.gmra.mrb[42].mxu1 %v838_v48 }
 0x143   : > { %1045 = vmatprep.mubr.f32.mxu0 %v1731_v0  ;;  %1206 = vmatprep.mubr.f32.mxu1 %v1731_v0 }
 0x146   : > { %1046 = vmatmul.mubr.f32.gmra.mrb[44].mxu0 %v839_v49  ;;  %1207 = vmatmul.mubr.f32.gmra.mrb[44].mxu1 %v839_v49 }
 0x147   : > { %1051 = vmatprep.mubr.f32.mxu0 %v1731_v0  ;;  %1212 = vmatprep.mubr.f32.mxu1 %v1731_v0 }
 0x14a   : > { %1052 = vmatmul.mubr.f32.gmra.mrb[46].mxu0 %v840_v50  ;;  %1213 = vmatmul.mubr.f32.gmra.mrb[46].mxu1 %v840_v50 }
 0x14b   : > { %1057 = vmatprep.mubr.f32.mxu0 %v1731_v0  ;;  %1218 = vmatprep.mubr.f32.mxu1 %v1731_v0 }
 0x14e   : > { %1058 = vmatmul.mubr.f32.gmra.mrb[48].mxu0 %v841_v51  ;;  %1219 = vmatmul.mubr.f32.gmra.mrb[48].mxu1 %v841_v51 }
 0x14f   : > { %1063 = vmatprep.mubr.f32.mxu0 %v1731_v0  ;;  %1224 = vmatprep.mubr.f32.mxu1 %v1731_v0 }
 0x152   : > { %1064 = vmatmul.mubr.f32.gmra.mrb[50].mxu0 %v842_v52  ;;  %1225 = vmatmul.mubr.f32.gmra.mrb[50].mxu1 %v842_v52 }
 0x153   : > { %1069 = vmatprep.mubr.f32.mxu0 %v1731_v0  ;;  %1230 = vmatprep.mubr.f32.mxu1 %v1731_v0 }
 0x156   : > { %1070 = vmatmul.mubr.f32.gmra.mrb[52].mxu0 %v843_v53  ;;  %1231 = vmatmul.mubr.f32.gmra.mrb[52].mxu1 %v843_v53 }
 0x157   : > { %1075 = vmatprep.mubr.f32.mxu0 %v1731_v0  ;;  %1236 = vmatprep.mubr.f32.mxu1 %v1731_v0 }
 0x15a   : > { %1076 = vmatmul.mubr.f32.gmra.mrb[54].mxu0 %v844_v54  ;;  %1237 = vmatmul.mubr.f32.gmra.mrb[54].mxu1 %v844_v54 }
 0x15b   : > { %1081 = vmatprep.mubr.f32.mxu0 %v1731_v0  ;;  %1242 = vmatprep.mubr.f32.mxu1 %v1731_v0 }
 0x15e   : > { %1082 = vmatmul.mubr.f32.gmra.mrb[56].mxu0 %v845_v55  ;;  %1243 = vmatmul.mubr.f32.gmra.mrb[56].mxu1 %v845_v55 }
 0x15f   : > { %1087 = vmatprep.mubr.f32.mxu0 %v1731_v0  ;;  %1248 = vmatprep.mubr.f32.mxu1 %v1731_v0 }
 0x162   : > { %1088 = vmatmul.mubr.f32.gmra.mrb[58].mxu0 %v846_v56  ;;  %1249 = vmatmul.mubr.f32.gmra.mrb[58].mxu1 %v846_v56 }
 0x163   : > { %1093 = vmatprep.mubr.f32.mxu0 %v1731_v0  ;;  %1254 = vmatprep.mubr.f32.mxu1 %v1731_v0 }
 0x166   : > { %1094 = vmatmul.mubr.f32.gmra.mrb[60].mxu0 %v847_v57  ;;  %1255 = vmatmul.mubr.f32.gmra.mrb[60].mxu1 %v847_v57  ;;  %v888_v57 = vpop.permute.xlu0 %887 }
 0x167   : > { %1099 = vmatprep.mubr.f32.mxu0 %v1731_v0  ;;  %1260 = vmatprep.mubr.f32.mxu1 %v1731_v0 }
 0x16a   : > { %1100 = vmatmul.mubr.f32.gmra.mrb[62].mxu0 %v848_v58  ;;  %1261 = vmatmul.mubr.f32.gmra.mrb[62].mxu1 %v848_v58 }
 0x16b   : > { %1402 = vmatprep.mubr.f32.mxu0 %v1731_v0  ;;  %1473 = vmatprep.mubr.f32.mxu1 %v1731_v0 }
 0x201   : > { %v1011_v59 = vpop.f32.mrb[32].mxu0  ;;  %v1172_v60 = vpop.f32.mrb[32].mxu1 }
 0x202   : > { %v1013_v61 = vpop.f32.mrb[33].mxu0  ;;  %v1174_v62 = vpop.f32.mrb[33].mxu1  ;;  %v1012_v2 = vadd.f32 %v1011_v59, %v868_v63  ;;  %v1173_v3 = vadd.f32 %v1172_v60, %v868_v63 }
 0x203   : > { %v1014_v4 = vadd.f32 %v1013_v61, %v868_v63  ;;  %v1175_v5 = vadd.f32 %v1174_v62, %v868_v63  ;;  %v893_v60 = vpop.permute.xlu1 %892 }
 0x204   : > { %v1267_v14 = vmax.f32 %v1012_v2, 0.0  ;;  %v1269_v0 = vmax.f32 %v1173_v3, 0.0 }
 0x205   : > { %v1017_v6 = vpop.f32.mrb[34].mxu0  ;;  %v1178_v7 = vpop.f32.mrb[34].mxu1  ;;  %v1268_v17 = vmax.f32 %v1014_v4, 0.0  ;;  %v1270_v18 = vmax.f32 %v1175_v5, 0.0 }
 0x206   : > { %v1018_v8 = vadd.f32 %v1017_v6, %v873_v1  ;;  %v1179_v9 = vadd.f32 %v1178_v7, %v873_v1  ;;  %v1019_v10 = vpop.f32.mrb[35].mxu0  ;;  %v1180_v11 = vpop.f32.mrb[35].mxu1 }
 0x207   : > { %v1020_v12 = vadd.f32 %v1019_v10, %v873_v1  ;;  %v1181_v13 = vadd.f32 %v1180_v11, %v873_v1 }
 0x208   : > { %v1271_v15 = vmax.f32 %v1018_v8, 0.0  ;;  %v1273_v16 = vmax.f32 %v1179_v9, 0.0 }
 0x209   : > { %v1272_v19 = vmax.f32 %v1020_v12, 0.0  ;;  %v1274_v20 = vmax.f32 %v1181_v13, 0.0  ;;  %v1023_v21 = vpop.f32.mrb[36].mxu0  ;;  %v1184_v22 = vpop.f32.mrb[36].mxu1 }
 0x20a   : > { %v1649_v23 = vpack.c.bf16 %v1271_v15, %v1267_v14  ;;  %v1681_v24 = vpack.c.bf16 %v1273_v16, %v1269_v0  ;;  %v1025_v25 = vpop.f32.mrb[37].mxu0  ;;  %v1186_v26 = vpop.f32.mrb[37].mxu1  ;;  %v1024_v31 = vadd.f32 %v1023_v21, %v878_v27  ;;  %v1185_v32 = vadd.f32 %v1184_v22, %v878_v27 }
 0x20b   : > { %v1647_v28 = vpack.c.bf16 %v1272_v19, %v1268_v17  ;;  %v1679_v29 = vpack.c.bf16 %v1274_v20, %v1270_v18  ;;  %v1026_v33 = vadd.f32 %v1025_v25, %v878_v27  ;;  %v1187_v34 = vadd.f32 %v1186_v26, %v878_v27  ;;  %v903_v26 = vpop.permute.xlu1 %902 }
 0x20c   : > { %v1275_v43 = vmax.f32 %v1024_v31, 0.0  ;;  %v1277_v44 = vmax.f32 %v1185_v32, 0.0 }
 0x20d   : > { %v1029_v35 = vpop.f32.mrb[38].mxu0  ;;  %v1190_v36 = vpop.f32.mrb[38].mxu1  ;;  %1648 = vmatprep.subr.bf16.mxu0 %v1647_v28  ;;  %1680 = vmatprep.subr.bf16.mxu1 %v1679_v29  ;;  %v1276_v47 = vmax.f32 %v1026_v33, 0.0  ;;  %v1278_v48 = vmax.f32 %v1187_v34, 0.0 }
 0x20e   : > { %v1030_v37 = vadd.f32 %v1029_v35, %v883_v30  ;;  %v1191_v38 = vadd.f32 %v1190_v36, %v883_v30  ;;  %v1031_v39 = vpop.f32.mrb[39].mxu0  ;;  %v1192_v40 = vpop.f32.mrb[39].mxu1  ;;  %1650 = vmatpush1.bf16.msra.mxu0 %v1649_v23  ;;  %1682 = vmatpush1.bf16.msra.mxu1 %v1681_v24 }
 0x20f   : > { %v1032_v41 = vadd.f32 %v1031_v39, %v883_v30  ;;  %v1193_v42 = vadd.f32 %v1192_v40, %v883_v30  ;;  %v898_v23 = vpop.permute.xlu0 %897 }
 0x210   : > { %v1279_v45 = vmax.f32 %v1030_v37, 0.0  ;;  %v1281_v46 = vmax.f32 %v1191_v38, 0.0 }
 0x211   : > { %v1280_v49 = vmax.f32 %v1032_v41, 0.0  ;;  %v1282_v50 = vmax.f32 %v1193_v42, 0.0  ;;  %v1035_v51 = vpop.f32.mrb[40].mxu0  ;;  %v1196_v52 = vpop.f32.mrb[40].mxu1 }
 0x212   : > { %v1653_v53 = vpack.c.bf16 %v1279_v45, %v1275_v43  ;;  %v1685_v54 = vpack.c.bf16 %v1281_v46, %v1277_v44  ;;  %v1037_v55 = vpop.f32.mrb[41].mxu0  ;;  %v1198_v56 = vpop.f32.mrb[41].mxu1  ;;  %v1036_v61 = vadd.f32 %v1035_v51, %v888_v57  ;;  %v1197_v62 = vadd.f32 %v1196_v52, %v888_v57 }
 0x213   : > { %v1651_v58 = vpack.c.bf16 %v1280_v49, %v1276_v47  ;;  %v1683_v59 = vpack.c.bf16 %v1282_v50, %v1278_v48  ;;  %v1038_v63 = vadd.f32 %v1037_v55, %v888_v57  ;;  %v1199_v1 = vadd.f32 %v1198_v56, %v888_v57  ;;  %v913_v56 = vpop.permute.xlu1 %912 }
 0x214   : > { %v1283_v10 = vmax.f32 %v1036_v61, 0.0  ;;  %v1285_v11 = vmax.f32 %v1197_v62, 0.0 }
 0x215   : > { %v1041_v2 = vpop.f32.mrb[42].mxu0  ;;  %v1202_v3 = vpop.f32.mrb[42].mxu1  ;;  %1652 = vmatprep.subr.bf16.mxu0 %v1651_v58  ;;  %1684 = vmatprep.subr.bf16.mxu1 %v1683_v59  ;;  %v1284_v14 = vmax.f32 %v1038_v63, 0.0  ;;  %v1286_v0 = vmax.f32 %v1199_v1, 0.0 }
 0x216   : > { %v1042_v4 = vadd.f32 %v1041_v2, %v893_v60  ;;  %v1203_v5 = vadd.f32 %v1202_v3, %v893_v60  ;;  %v1043_v6 = vpop.f32.mrb[43].mxu0  ;;  %v1204_v7 = vpop.f32.mrb[43].mxu1  ;;  %1654 = vmatpush1.bf16.msra.mxu0 %v1653_v53  ;;  %1686 = vmatpush1.bf16.msra.mxu1 %v1685_v54 }
 0x217   : > { %v1044_v8 = vadd.f32 %v1043_v6, %v893_v60  ;;  %v1205_v9 = vadd.f32 %v1204_v7, %v893_v60  ;;  %v908_v53 = vpop.permute.xlu0 %907 }
 0x218   : > { %v1287_v12 = vmax.f32 %v1042_v4, 0.0  ;;  %v1289_v13 = vmax.f32 %v1203_v5, 0.0 }
 0x219   : > { %v1288_v15 = vmax.f32 %v1044_v8, 0.0  ;;  %v1290_v16 = vmax.f32 %v1205_v9, 0.0  ;;  %v1047_v17 = vpop.f32.mrb[44].mxu0  ;;  %v1208_v18 = vpop.f32.mrb[44].mxu1 }
 0x21a   : > { %v1657_v19 = vpack.c.bf16 %v1287_v12, %v1283_v10  ;;  %v1689_v20 = vpack.c.bf16 %v1289_v13, %v1285_v11  ;;  %v1049_v21 = vpop.f32.mrb[45].mxu0  ;;  %v1210_v22 = vpop.f32.mrb[45].mxu1  ;;  %v1048_v27 = vadd.f32 %v1047_v17, %v898_v23  ;;  %v1209_v28 = vadd.f32 %v1208_v18, %v898_v23 }
 0x21b   : > { %v1655_v24 = vpack.c.bf16 %v1288_v15, %v1284_v14  ;;  %v1687_v25 = vpack.c.bf16 %v1290_v16, %v1286_v0  ;;  %v1050_v29 = vadd.f32 %v1049_v21, %v898_v23  ;;  %v1211_v30 = vadd.f32 %v1210_v22, %v898_v23  ;;  %v923_v22 = vpop.permute.xlu1 %922 }
 0x21c   : > { %v1291_v39 = vmax.f32 %v1048_v27, 0.0  ;;  %v1293_v40 = vmax.f32 %v1209_v28, 0.0 }
 0x21d   : > { %v1053_v31 = vpop.f32.mrb[46].mxu0  ;;  %v1214_v32 = vpop.f32.mrb[46].mxu1  ;;  %1656 = vmatprep.subr.bf16.mxu0 %v1655_v24  ;;  %1688 = vmatprep.subr.bf16.mxu1 %v1687_v25  ;;  %v1292_v43 = vmax.f32 %v1050_v29, 0.0  ;;  %v1294_v44 = vmax.f32 %v1211_v30, 0.0 }
 0x21e   : > { %v1054_v33 = vadd.f32 %v1053_v31, %v903_v26  ;;  %v1215_v34 = vadd.f32 %v1214_v32, %v903_v26  ;;  %v1055_v35 = vpop.f32.mrb[47].mxu0  ;;  %v1216_v36 = vpop.f32.mrb[47].mxu1  ;;  %1658 = vmatpush1.bf16.msra.mxu0 %v1657_v19  ;;  %1690 = vmatpush1.bf16.msra.mxu1 %v1689_v20 }
 0x21f   : > { %v1056_v37 = vadd.f32 %v1055_v35, %v903_v26  ;;  %v1217_v38 = vadd.f32 %v1216_v36, %v903_v26  ;;  %v918_v19 = vpop.permute.xlu0 %917 }
 0x220   : > { %v1295_v41 = vmax.f32 %v1054_v33, 0.0  ;;  %v1297_v42 = vmax.f32 %v1215_v34, 0.0 }
 0x221   : > { %v1296_v45 = vmax.f32 %v1056_v37, 0.0  ;;  %v1298_v46 = vmax.f32 %v1217_v38, 0.0  ;;  %v1059_v47 = vpop.f32.mrb[48].mxu0  ;;  %v1220_v48 = vpop.f32.mrb[48].mxu1 }
 0x222   : > { %v1661_v49 = vpack.c.bf16 %v1295_v41, %v1291_v39  ;;  %v1693_v50 = vpack.c.bf16 %v1297_v42, %v1293_v40  ;;  %v1061_v51 = vpop.f32.mrb[49].mxu0  ;;  %v1222_v52 = vpop.f32.mrb[49].mxu1  ;;  %v1060_v57 = vadd.f32 %v1059_v47, %v908_v53  ;;  %v1221_v58 = vadd.f32 %v1220_v48, %v908_v53 }
 0x223   : > { %v1659_v54 = vpack.c.bf16 %v1296_v45, %v1292_v43  ;;  %v1691_v55 = vpack.c.bf16 %v1298_v46, %v1294_v44  ;;  %v1062_v59 = vadd.f32 %v1061_v51, %v908_v53  ;;  %v1223_v60 = vadd.f32 %v1222_v52, %v908_v53  ;;  %v933_v52 = vpop.permute.xlu1 %932 }
 0x224   : > { %v1299_v6 = vmax.f32 %v1060_v57, 0.0  ;;  %v1301_v7 = vmax.f32 %v1221_v58, 0.0 }
 0x225   : > { %v1065_v61 = vpop.f32.mrb[50].mxu0  ;;  %v1226_v62 = vpop.f32.mrb[50].mxu1  ;;  %1660 = vmatprep.subr.bf16.mxu0 %v1659_v54  ;;  %1692 = vmatprep.subr.bf16.mxu1 %v1691_v55  ;;  %v1300_v10 = vmax.f32 %v1062_v59, 0.0  ;;  %v1302_v11 = vmax.f32 %v1223_v60, 0.0 }
 0x226   : > { %v1066_v63 = vadd.f32 %v1065_v61, %v913_v56  ;;  %v1227_v1 = vadd.f32 %v1226_v62, %v913_v56  ;;  %v1067_v2 = vpop.f32.mrb[51].mxu0  ;;  %v1228_v3 = vpop.f32.mrb[51].mxu1  ;;  %1662 = vmatpush1.bf16.msra.mxu0 %v1661_v49  ;;  %1694 = vmatpush1.bf16.msra.mxu1 %v1693_v50 }
 0x227   : > { %v1068_v4 = vadd.f32 %v1067_v2, %v913_v56  ;;  %v1229_v5 = vadd.f32 %v1228_v3, %v913_v56  ;;  %v928_v49 = vpop.permute.xlu0 %927 }
 0x228   : > { %v1303_v8 = vmax.f32 %v1066_v63, 0.0  ;;  %v1305_v9 = vmax.f32 %v1227_v1, 0.0 }
 0x229   : > { %v1304_v12 = vmax.f32 %v1068_v4, 0.0  ;;  %v1306_v13 = vmax.f32 %v1229_v5, 0.0  ;;  %v1071_v14 = vpop.f32.mrb[52].mxu0  ;;  %v1232_v0 = vpop.f32.mrb[52].mxu1 }
 0x22a   : > { %v1665_v15 = vpack.c.bf16 %v1303_v8, %v1299_v6  ;;  %v1697_v16 = vpack.c.bf16 %v1305_v9, %v1301_v7  ;;  %v1073_v17 = vpop.f32.mrb[53].mxu0  ;;  %v1234_v18 = vpop.f32.mrb[53].mxu1  ;;  %v1072_v23 = vadd.f32 %v1071_v14, %v918_v19  ;;  %v1233_v24 = vadd.f32 %v1232_v0, %v918_v19 }
 0x22b   : > { %v1663_v20 = vpack.c.bf16 %v1304_v12, %v1300_v10  ;;  %v1695_v21 = vpack.c.bf16 %v1306_v13, %v1302_v11  ;;  %v1074_v25 = vadd.f32 %v1073_v17, %v918_v19  ;;  %v1235_v26 = vadd.f32 %v1234_v18, %v918_v19  ;;  %v943_v18 = vpop.permute.xlu1 %942 }
 0x22c   : > { %v1307_v35 = vmax.f32 %v1072_v23, 0.0  ;;  %v1309_v36 = vmax.f32 %v1233_v24, 0.0 }
 0x22d   : > { %v1077_v27 = vpop.f32.mrb[54].mxu0  ;;  %v1238_v28 = vpop.f32.mrb[54].mxu1  ;;  %1664 = vmatprep.subr.bf16.mxu0 %v1663_v20  ;;  %1696 = vmatprep.subr.bf16.mxu1 %v1695_v21  ;;  %v1308_v39 = vmax.f32 %v1074_v25, 0.0  ;;  %v1310_v40 = vmax.f32 %v1235_v26, 0.0 }
 0x22e   : > { %v1078_v29 = vadd.f32 %v1077_v27, %v923_v22  ;;  %v1239_v30 = vadd.f32 %v1238_v28, %v923_v22  ;;  %v1079_v31 = vpop.f32.mrb[55].mxu0  ;;  %v1240_v32 = vpop.f32.mrb[55].mxu1  ;;  %1666 = vmatpush1.bf16.msra.mxu0 %v1665_v15  ;;  %1698 = vmatpush1.bf16.msra.mxu1 %v1697_v16 }
 0x22f   : > { %v1080_v33 = vadd.f32 %v1079_v31, %v923_v22  ;;  %v1241_v34 = vadd.f32 %v1240_v32, %v923_v22  ;;  %v938_v15 = vpop.permute.xlu0 %937 }
 0x230   : > { %v1311_v37 = vmax.f32 %v1078_v29, 0.0  ;;  %v1313_v38 = vmax.f32 %v1239_v30, 0.0 }
 0x231   : > { %v1312_v41 = vmax.f32 %v1080_v33, 0.0  ;;  %v1314_v42 = vmax.f32 %v1241_v34, 0.0  ;;  %v1083_v43 = vpop.f32.mrb[56].mxu0  ;;  %v1244_v44 = vpop.f32.mrb[56].mxu1 }
 0x232   : > { %v1669_v45 = vpack.c.bf16 %v1311_v37, %v1307_v35  ;;  %v1701_v46 = vpack.c.bf16 %v1313_v38, %v1309_v36  ;;  %v1085_v47 = vpop.f32.mrb[57].mxu0  ;;  %v1246_v48 = vpop.f32.mrb[57].mxu1  ;;  %v1084_v53 = vadd.f32 %v1083_v43, %v928_v49  ;;  %v1245_v54 = vadd.f32 %v1244_v44, %v928_v49  ;;  %v1331_v43 = vld [vmem:[%s2098_s5] sm:$0xff] }
 0x233   : > { %v1667_v50 = vpack.c.bf16 %v1312_v41, %v1308_v39  ;;  %v1699_v51 = vpack.c.bf16 %v1314_v42, %v1310_v40  ;;  %v1086_v55 = vadd.f32 %v1085_v47, %v928_v49  ;;  %v1247_v56 = vadd.f32 %v1246_v48, %v928_v49  ;;  %v1336_v44 = vpop.permute.xlu0 %1335 }
 0x234   : > { %v1315_v2 = vmax.f32 %v1084_v53, 0.0  ;;  %v1317_v3 = vmax.f32 %v1245_v54, 0.0 }
 0x235   : > { %v1089_v57 = vpop.f32.mrb[58].mxu0  ;;  %v1250_v58 = vpop.f32.mrb[58].mxu1  ;;  %1668 = vmatprep.subr.bf16.mxu0 %v1667_v50  ;;  %1700 = vmatprep.subr.bf16.mxu1 %v1699_v51  ;;  %v1316_v6 = vmax.f32 %v1086_v55, 0.0  ;;  %v1318_v7 = vmax.f32 %v1247_v56, 0.0 }
 0x236   : > { %v1090_v59 = vadd.f32 %v1089_v57, %v933_v52  ;;  %v1251_v60 = vadd.f32 %v1250_v58, %v933_v52  ;;  %v1091_v61 = vpop.f32.mrb[59].mxu0  ;;  %v1252_v62 = vpop.f32.mrb[59].mxu1  ;;  %1670 = vmatpush1.bf16.msra.mxu0 %v1669_v45  ;;  %1702 = vmatpush1.bf16.msra.mxu1 %v1701_v46 }
 0x237   : > { %v1092_v63 = vadd.f32 %v1091_v61, %v933_v52  ;;  %v1253_v1 = vadd.f32 %v1252_v62, %v933_v52 }
 0x238   : > { %v1319_v4 = vmax.f32 %v1090_v59, 0.0  ;;  %v1321_v5 = vmax.f32 %v1251_v60, 0.0 }
 0x239   : > { %v1320_v8 = vmax.f32 %v1092_v63, 0.0  ;;  %v1322_v9 = vmax.f32 %v1253_v1, 0.0  ;;  %v1095_v10 = vpop.f32.mrb[60].mxu0  ;;  %v1256_v11 = vpop.f32.mrb[60].mxu1 }
 0x23a   : > { %v1673_v12 = vpack.c.bf16 %v1319_v4, %v1315_v2  ;;  %v1705_v13 = vpack.c.bf16 %v1321_v5, %v1317_v3  ;;  %v1097_v14 = vpop.f32.mrb[61].mxu0  ;;  %v1258_v0 = vpop.f32.mrb[61].mxu1  ;;  %v1096_v19 = vadd.f32 %v1095_v10, %v938_v15  ;;  %v1257_v20 = vadd.f32 %v1256_v11, %v938_v15 }
 0x23b   : > { %v1671_v16 = vpack.c.bf16 %v1320_v8, %v1316_v6  ;;  %v1703_v17 = vpack.c.bf16 %v1322_v9, %v1318_v7  ;;  %v1098_v21 = vadd.f32 %v1097_v14, %v938_v15  ;;  %v1259_v22 = vadd.f32 %v1258_v0, %v938_v15 }
 0x23c   : > { %v1323_v31 = vmax.f32 %v1096_v19, 0.0  ;;  %v1325_v32 = vmax.f32 %v1257_v20, 0.0 }
 0x23d   : > { %v1101_v23 = vpop.f32.mrb[62].mxu0  ;;  %v1262_v24 = vpop.f32.mrb[62].mxu1  ;;  %1672 = vmatprep.subr.bf16.mxu0 %v1671_v16  ;;  %1704 = vmatprep.subr.bf16.mxu1 %v1703_v17  ;;  %v1324_v35 = vmax.f32 %v1098_v21, 0.0  ;;  %v1326_v36 = vmax.f32 %v1259_v22, 0.0 }
 0x23e   : > { %v1102_v25 = vadd.f32 %v1101_v23, %v943_v18  ;;  %v1263_v26 = vadd.f32 %v1262_v24, %v943_v18  ;;  %v1103_v27 = vpop.f32.mrb[63].mxu0  ;;  %v1264_v28 = vpop.f32.mrb[63].mxu1  ;;  %1674 = vmatpush1.bf16.msra.mxu0 %v1673_v12  ;;  %1706 = vmatpush1.bf16.msra.mxu1 %v1705_v13 }
 0x23f   : > { %v1104_v29 = vadd.f32 %v1103_v27, %v943_v18  ;;  %v1265_v30 = vadd.f32 %v1264_v28, %v943_v18 }
 0x240   : > { %v1327_v33 = vmax.f32 %v1102_v25, 0.0  ;;  %v1329_v34 = vmax.f32 %v1263_v26, 0.0 }
 0x241   : > { %v1328_v37 = vmax.f32 %v1104_v29, 0.0  ;;  %v1330_v38 = vmax.f32 %v1265_v30, 0.0 }
 0x242   : > { %v1677_v39 = vpack.c.bf16 %v1327_v33, %v1323_v31  ;;  %v1709_v40 = vpack.c.bf16 %v1329_v34, %v1325_v32 }
 0x243   : > { %v1675_v41 = vpack.c.bf16 %v1328_v37, %v1324_v35  ;;  %v1707_v42 = vpack.c.bf16 %v1330_v38, %v1326_v36 }
 0x245   : > { %1676 = vmatprep.subr.bf16.mxu0 %v1675_v41  ;;  %1708 = vmatprep.subr.bf16.mxu1 %v1707_v42 }
 0x246   : > { %1678 = vmatpush1.bf16.msra.mxu0 %v1677_v39  ;;  %1710 = vmatpush1.bf16.msra.mxu1 %v1709_v40 }
 0x249   : > { %1403 = vmatmul.mubr.f32.vlgmr.msra.gmra.mrb[64].mxu0 %v1331_v43  ;;  %1474 = vmatmul.mubr.f32.vlgmr.msra.gmra.mrb[64].mxu1 %v1331_v43 }
 0x31c   : > { %v1404_v45 = vpop.f32.mrb[64].mxu0  ;;  %v1475_v46 = vpop.f32.mrb[64].mxu1 }
 0x31d   : > { %v1405_v47 = vadd.f32 %v1404_v45, %v1336_v44  ;;  %v1406_v48 = vpop.f32.mrb[65].mxu0  ;;  %v1477_v49 = vpop.f32.mrb[65].mxu1  ;;  %v1476_v51 = vadd.f32 %v1475_v46, %v1336_v44 }
 0x31e   : > { %v1407_v50 = vadd.f32 %v1406_v48, %v1336_v44  ;;  %v1478_v52 = vadd.f32 %v1477_v49, %v1336_v44 }
 0x31f   : > { %1480 = vst [vmem:[%s280_s22] sm:$0xff] %v1405_v47  ;;  %1482 = vst [vmem:[%s280_s22 + $0x10] sm:$0xff] %v1476_v51 }
 0x320   : > { %1481 = vst [vmem:[%s280_s22 + $0x8] sm:$0xff] %v1407_v50  ;;  %1483 = vst [vmem:[%s280_s22 + $0x18] sm:$0xff] %v1478_v52 }
 0x321 PF: > { %s17_s24 = sadd.s32 1, %s1729_s24  }
 0x322   : > { %p14_p4 = scmp.ge.s32.totalorder %s17_s24, 4  }
 0x324   :  { %16 = sbr.rel (!%p14_p4) target bundleno = 1 (0x1), region = 78 }

</bundles_post_ra>
